<compile_context>
chip_gen: v6e
topology: v6e:2x2x1
jax: 0.10.0
libtpu: 0.0.40
codegen_flags: <defaults>
</compile_context>

<pallas_src>
import jax
import jax.numpy as jnp
from jax.experimental import pallas as pl
from jax.experimental.pallas import tpu as pltpu


def _fc_head_kernel(x_ref, w_ref, b_ref, m_ref, e_ref, o_ref):
    # x: (Nb, C, T)  w: (K, C)  b: (K, 1)  m: (Nb, 1, T)  e: (T, Tup)  o: (Nb, K, Tup)
    nb = x_ref.shape[0]
    w = w_ref[...]
    b = b_ref[...]
    e = e_ref[...]
    for n in range(nb):  # short static unroll over the batch items of this block
        # FC in the feature's native [C, T] layout: (K,C)@(C,T) -> (K,T), f32 accumulate.
        s = jnp.dot(w, x_ref[n], preferred_element_type=jnp.float32)
        s = (s + b) * m_ref[n]              # bias (broadcast over T) + strided mask (over K)
        s = s.astype(o_ref.dtype)           # round once, before the exact selection matmul
        # Fused nearest-neighbour x sample_rate upsample: 0/1 selection matmul in the
        # output dtype (bit-exact: each output element selects exactly one s value).
        o_ref[n] = jnp.dot(s, e)            # (K, Tup)


def _pick_block_n(n, per_item_bytes, *, vmem_budget_bytes=12 << 20, min_steps=4, max_block=16):
    """Largest batch block that (a) fits a conservative streamed-VMEM budget
    (double-buffered feature/mask/output, safe under the v5e 16 MiB scoped default and
    v7x's smaller VMEM), (b) keeps >= min_steps grid steps for megacore sharding when
    the batch allows it, and (c) divides N so the grid is exact."""
    nb = max(1, min(n, vmem_budget_bytes // max(per_item_bytes, 1), max_block))
    if n >= min_steps:
        nb = min(nb, max(1, n // min_steps))
    while n % nb:
        nb -= 1
    return nb


def text_pred_fc_head_forward(feature, masks, weight, bias, *,
                              clip_seg_num, sample_rate, num_classes,
                              vmem_limit_bytes=None):
    """feature: [N, C, T]; masks: [N, T*sr]; weight: [K, C] (nn.Linear layout); bias: [K]."""
    N, C, T = feature.shape
    assert T == clip_seg_num
    K = num_classes
    sr = sample_rate
    Tup = T * sr
    # masks[:, ::sr] silently assumes this; make it explicit.
    assert masks.shape == (N, Tup), (masks.shape, (N, Tup))

    out_dtype = feature.dtype
    in_b = jnp.dtype(feature.dtype).itemsize
    out_b = jnp.dtype(out_dtype).itemsize

    # strided mask sample (== masks.unsqueeze(1)[:, 0:1, ::sr]) as a lane-dense row
    mask_t = masks[:, ::sr].reshape(N, 1, T).astype(jnp.float32)
    b2d = bias.reshape(K, 1).astype(jnp.float32)
    # 0/1 nearest-upsample selection matrix, stored in the OUTPUT dtype (bit-exact
    # repeat since it is a pure selection matrix): E[t, t*sr + j] = 1
    expand = (jax.lax.broadcasted_iota(jnp.int32, (T, Tup), 1) // sr
              == jax.lax.broadcasted_iota(jnp.int32, (T, Tup), 0)).astype(out_dtype)

    # streamed (double-buffered) bytes for one batch item: feature + mask + output
    per_item = 2 * (C * T * in_b + T * 4 + K * Tup * out_b)
    Nb = _pick_block_n(N, per_item)

    flops = 2 * N * K * C * T + 2 * N * K * T * Tup
    bytes_accessed = (feature.size * in_b
                      + weight.size * jnp.dtype(weight.dtype).itemsize
                      + b2d.size * 4 + mask_t.size * 4
                      + expand.size * out_b + N * K * Tup * out_b)

    score = pl.pallas_call(
        _fc_head_kernel,
        out_shape=jax.ShapeDtypeStruct((N, K, Tup), out_dtype),
        grid=(N // Nb,),
        in_specs=[
            pl.BlockSpec((Nb, C, T), lambda g: (g, 0, 0)),   # batch-block of features (streamed)
            pl.BlockSpec((K, C), lambda g: (0, 0)),          # weight, resident across grid
            pl.BlockSpec((K, 1), lambda g: (0, 0)),          # bias, resident
            pl.BlockSpec((Nb, 1, T), lambda g: (g, 0, 0)),   # batch-block of mask rows (streamed)
            pl.BlockSpec((T, Tup), lambda g: (0, 0)),        # upsample selector, resident
        ],
        out_specs=pl.BlockSpec((Nb, K, Tup), lambda g: (g, 0, 0)),
        compiler_params=pltpu.CompilerParams(
            dimension_semantics=("parallel",),               # shard batch blocks across TCs
            vmem_limit_bytes=vmem_limit_bytes),
        cost_estimate=pl.CostEstimate(
            flops=flops, transcendentals=0, bytes_accessed=bytes_accessed),
    )(feature, weight, b2d, mask_t, expand)

    return score[None]   # [1, N, K, T*sr]


def _reference(feature, masks, weight, bias, *, clip_seg_num, sample_rate, num_classes):
    N, C, T = feature.shape
    x = jnp.transpose(feature, (0, 2, 1)).reshape(N * T, C).astype(jnp.float32)
    s = x @ weight.astype(jnp.float32).T + bias.astype(jnp.float32)
    s = s.reshape(N, T, num_classes).transpose(0, 2, 1)
    s = s * masks[:, None, ::sample_rate]
    return jnp.repeat(s, sample_rate, axis=-1)[None]


if __name__ == "__main__":
    # Small, module-consistent shapes.  clip_seg_num * sample_rate = 128 so the
    # kernel's largest store is lane-dense; N=8 exercises the blocked grid (Nb=2,
    # 4 grid steps, batch axis shardable over both TensorCores).
    N = 8
    in_channels = 128
    clip_seg_num = 32
    sample_rate = 4
    num_classes = 16
    init_std = 0.01

    key = jax.random.PRNGKey(0)
    k_feat, k_mask, k_w, k_b = jax.random.split(key, 4)

    feature = jax.random.normal(k_feat, (N, in_channels, clip_seg_num), dtype=jnp.float32)
    masks = (jax.random.uniform(k_mask, (N, clip_seg_num * sample_rate)) > 0.3).astype(jnp.float32)

    # Parameters mirror normal_init(fc, std=init_std), PyTorch nn.Linear layout [K, C].
    weight = init_std * jax.random.normal(k_w, (num_classes, in_channels), dtype=jnp.float32)
    bias = init_std * jax.random.normal(k_b, (num_classes,), dtype=jnp.float32)

    # --- f32 path ---
    out = text_pred_fc_head_forward(
        feature, masks, weight, bias,
        clip_seg_num=clip_seg_num, sample_rate=sample_rate, num_classes=num_classes)
    out = jax.block_until_ready(out)
    ref = _reference(feature, masks, weight, bias,
                     clip_seg_num=clip_seg_num, sample_rate=sample_rate,
                     num_classes=num_classes)
    assert out.shape == (1, N, num_classes, clip_seg_num * sample_rate), out.shape
    assert jnp.allclose(out, ref, atol=1e-4, rtol=1e-3), float(jnp.max(jnp.abs(out - ref)))

    # --- bf16 activations/weights (native MXU path, f32 FC accumulation, bf16 E) ---
    out_bf = text_pred_fc_head_forward(
        feature.astype(jnp.bfloat16), masks, weight.astype(jnp.bfloat16), bias,
        clip_seg_num=clip_seg_num, sample_rate=sample_rate, num_classes=num_classes)
    out_bf = jax.block_until_ready(out_bf)
    ref_bf = _reference(feature.astype(jnp.bfloat16).astype(jnp.float32), masks,
                        weight.astype(jnp.bfloat16).astype(jnp.float32), bias,
                        clip_seg_num=clip_seg_num, sample_rate=sample_rate,
                        num_classes=num_classes)
    assert out_bf.shape == (1, N, num_classes, clip_seg_num * sample_rate), out_bf.shape
    assert jnp.allclose(out_bf.astype(jnp.float32), ref_bf, atol=1e-2, rtol=5e-2)

    print("KERNEL_OK")
</pallas_src>

<mosaic_0001>
module attributes {stable_mosaic.version = 11 : i64} {
  func.func @_fc_head_kernel(%arg0: i32, %arg1: memref<2x128x32xf32, #tpu.memory_space<vmem>>, %arg2: memref<16x128xf32, #tpu.memory_space<vmem>>, %arg3: memref<16x1xf32, #tpu.memory_space<vmem>>, %arg4: memref<2x1x32xf32, #tpu.memory_space<vmem>>, %arg5: memref<32x128xf32, #tpu.memory_space<vmem>>, %arg6: memref<2x16x128xf32, #tpu.memory_space<vmem>>) attributes {dimension_semantics = [#tpu.dimension_semantics<parallel>], iteration_bounds = array<i64: 4>, scalar_prefetch = 0 : i64, scratch_operands = 0 : i64, tpu.core_type = #tpu.core_type<tc>, window_params = [{transform_indices = @transform_0, window_bounds = array<i64: 2, 128, 32>}, {pipeline_mode = #tpu.pipeline_mode<synchronous>, transform_indices = @transform_1, window_bounds = array<i64: 16, 128>}, {pipeline_mode = #tpu.pipeline_mode<synchronous>, transform_indices = @transform_2, window_bounds = array<i64: 16, 1>}, {transform_indices = @transform_3, window_bounds = array<i64: 2, 1, 32>}, {pipeline_mode = #tpu.pipeline_mode<synchronous>, transform_indices = @transform_4, window_bounds = array<i64: 32, 128>}, {transform_indices = @transform_5, window_bounds = array<i64: 2, 16, 128>}]} {
    %c0 = arith.constant 0 : index
    %c0_0 = arith.constant 0 : index
    %0 = vector.load %arg2[%c0, %c0_0] : memref<16x128xf32, #tpu.memory_space<vmem>>, vector<16x128xf32>
    %c0_1 = arith.constant 0 : index
    %c0_2 = arith.constant 0 : index
    %1 = vector.load %arg3[%c0_1, %c0_2] : memref<16x1xf32, #tpu.memory_space<vmem>>, vector<16x1xf32>
    %c0_3 = arith.constant 0 : index
    %c0_4 = arith.constant 0 : index
    %2 = vector.load %arg5[%c0_3, %c0_4] : memref<32x128xf32, #tpu.memory_space<vmem>>, vector<32x128xf32>
    %c0_5 = arith.constant 0 : index
    %c0_6 = arith.constant 0 : index
    %c0_7 = arith.constant 0 : index
    %3 = vector.load %arg1[%c0_5, %c0_6, %c0_7] : memref<2x128x32xf32, #tpu.memory_space<vmem>>, vector<1x128x32xf32>
    %4 = vector.shape_cast %3 : vector<1x128x32xf32> to vector<128x32xf32>
    %cst = arith.constant dense<0.000000e+00> : vector<16x32xf32>
    %5 = tpu.matmul %0, %4, %cst {dimension_numbers = #tpu.dot_dimension_numbers<[1], [0], [0], [1], [0, 0, 1, 1], [], []>} : vector<16x128xf32>, vector<128x32xf32>, vector<16x32xf32> -> vector<16x32xf32>
    %6 = vector.broadcast %1 : vector<16x1xf32> to vector<16x32xf32>
    %7 = arith.addf %5, %6 : vector<16x32xf32>
    %c0_8 = arith.constant 0 : index
    %c0_9 = arith.constant 0 : index
    %c0_10 = arith.constant 0 : index
    %8 = vector.load %arg4[%c0_8, %c0_9, %c0_10] : memref<2x1x32xf32, #tpu.memory_space<vmem>>, vector<1x1x32xf32>
    %9 = vector.shape_cast %8 : vector<1x1x32xf32> to vector<1x32xf32>
    %10 = vector.broadcast %9 : vector<1x32xf32> to vector<16x32xf32>
    %11 = arith.mulf %7, %10 : vector<16x32xf32>
    %cst_11 = arith.constant dense<0.000000e+00> : vector<16x128xf32>
    %12 = tpu.matmul %11, %2, %cst_11 {dimension_numbers = #tpu.dot_dimension_numbers<[1], [0], [0], [1], [0, 0, 1, 1], [], []>} : vector<16x32xf32>, vector<32x128xf32>, vector<16x128xf32> -> vector<16x128xf32>
    %c0_12 = arith.constant 0 : index
    %c0_13 = arith.constant 0 : index
    %c0_14 = arith.constant 0 : index
    %13 = vector.load %arg6[%c0_12, %c0_13, %c0_14] : memref<2x16x128xf32, #tpu.memory_space<vmem>>, vector<1x16x128xf32>
    %14 = vector.shape_cast %13 : vector<1x16x128xf32> to vector<16x128xf32>
    %15 = vector.shape_cast %12 : vector<16x128xf32> to vector<1x16x128xf32>
    tpu.vector_store %arg6[%c0_12, %c0_13, %c0_14], %15 {strides = array<i32>} : memref<2x16x128xf32, #tpu.memory_space<vmem>>, vector<1x16x128xf32>,
    %c1 = arith.constant 1 : index
    %c0_15 = arith.constant 0 : index
    %c0_16 = arith.constant 0 : index
    %16 = vector.load %arg1[%c1, %c0_15, %c0_16] : memref<2x128x32xf32, #tpu.memory_space<vmem>>, vector<1x128x32xf32>
    %17 = vector.shape_cast %16 : vector<1x128x32xf32> to vector<128x32xf32>
    %cst_17 = arith.constant dense<0.000000e+00> : vector<16x32xf32>
    %18 = tpu.matmul %0, %17, %cst_17 {dimension_numbers = #tpu.dot_dimension_numbers<[1], [0], [0], [1], [0, 0, 1, 1], [], []>} : vector<16x128xf32>, vector<128x32xf32>, vector<16x32xf32> -> vector<16x32xf32>
    %19 = vector.broadcast %1 : vector<16x1xf32> to vector<16x32xf32>
    %20 = arith.addf %18, %19 : vector<16x32xf32>
    %c1_18 = arith.constant 1 : index
    %c0_19 = arith.constant 0 : index
    %c0_20 = arith.constant 0 : index
    %21 = vector.load %arg4[%c1_18, %c0_19, %c0_20] : memref<2x1x32xf32, #tpu.memory_space<vmem>>, vector<1x1x32xf32>
    %22 = vector.shape_cast %21 : vector<1x1x32xf32> to vector<1x32xf32>
    %23 = vector.broadcast %22 : vector<1x32xf32> to vector<16x32xf32>
    %24 = arith.mulf %20, %23 : vector<16x32xf32>
    %cst_21 = arith.constant dense<0.000000e+00> : vector<16x128xf32>
    %25 = tpu.matmul %24, %2, %cst_21 {dimension_numbers = #tpu.dot_dimension_numbers<[1], [0], [0], [1], [0, 0, 1, 1], [], []>} : vector<16x32xf32>, vector<32x128xf32>, vector<16x128xf32> -> vector<16x128xf32>
    %c1_22 = arith.constant 1 : index
    %c0_23 = arith.constant 0 : index
    %c0_24 = arith.constant 0 : index
    %26 = vector.load %arg6[%c1_22, %c0_23, %c0_24] : memref<2x16x128xf32, #tpu.memory_space<vmem>>, vector<1x16x128xf32>
    %27 = vector.shape_cast %26 : vector<1x16x128xf32> to vector<16x128xf32>
    %28 = vector.shape_cast %25 : vector<16x128xf32> to vector<1x16x128xf32>
    tpu.vector_store %arg6[%c1_22, %c0_23, %c0_24], %28 {strides = array<i32>} : memref<2x16x128xf32, #tpu.memory_space<vmem>>, vector<1x16x128xf32>,
    return
  }
  func.func @transform_0(%arg0: i32) -> (i32, i32, i32) {
    %c0_i32 = arith.constant 0 : i32
    %c0_i32_0 = arith.constant 0 : i32
    %c0_i32_1 = arith.constant 0 : i32
    return %arg0, %c0_i32, %c0_i32_0 : i32, i32, i32
  }
  func.func @transform_1(%arg0: i32) -> (i32, i32) {
    %c0_i32 = arith.constant 0 : i32
    %c0_i32_0 = arith.constant 0 : i32
    %c0_i32_1 = arith.constant 0 : i32
    return %c0_i32, %c0_i32_0 : i32, i32
  }
  func.func @transform_2(%arg0: i32) -> (i32, i32) {
    %c0_i32 = arith.constant 0 : i32
    %c0_i32_0 = arith.constant 0 : i32
    %c0_i32_1 = arith.constant 0 : i32
    return %c0_i32, %c0_i32_0 : i32, i32
  }
  func.func @transform_3(%arg0: i32) -> (i32, i32, i32) {
    %c0_i32 = arith.constant 0 : i32
    %c0_i32_0 = arith.constant 0 : i32
    %c0_i32_1 = arith.constant 0 : i32
    return %arg0, %c0_i32, %c0_i32_0 : i32, i32, i32
  }
  func.func @transform_4(%arg0: i32) -> (i32, i32) {
    %c0_i32 = arith.constant 0 : i32
    %c0_i32_0 = arith.constant 0 : i32
    %c0_i32_1 = arith.constant 0 : i32
    return %c0_i32, %c0_i32_0 : i32, i32
  }
  func.func @transform_5(%arg0: i32) -> (i32, i32, i32) {
    %c0_i32 = arith.constant 0 : i32
    %c0_i32_0 = arith.constant 0 : i32
    %c0_i32_1 = arith.constant 0 : i32
    return %arg0, %c0_i32, %c0_i32_0 : i32, i32, i32
  }
}

</mosaic_0001>

<bundles_post_ra>
// kernel: tpu_custom_call.1
= control target key start
LH: loop header
LB: loop body
LE: loop exit
PB: predicated region body
PF: predicated region fallthrough
CT: control target
= control target key end

     0   :  { %10 = vsyncpa [#allocation3], 0  ;;  %s1234_s0 = inlined_call_operand.vmem [shape: f32[8,128,32], index: 0, kind: input, shape index: {}]   ;;  %s1235_s1 = inlined_call_operand.vmem [shape: f32[16,128], index: 1, kind: input, shape index: {}]   ;;  %s1236_s2 = inlined_call_operand.vmem [shape: f32[16,1], index: 2, kind: input, shape index: {}]   ;;  %s1237_s3 = inlined_call_operand.vmem [shape: f32[8,1,32], index: 3, kind: input, shape index: {}]   ;;  %s1238_s4 = inlined_call_operand.vmem [shape: f32[32,128], index: 4, kind: input, shape index: {}]   ;;  %s1239_s5 = inlined_call_operand.hbm [shape: f32[8,16,128], index: 5, kind: output, shape index: {}]  }
   0x1   :  { %12 = vsyncpa [#allocation3 + $0x1], 0  ;;  %s1044_s18 = smov 0   ;;  %s1046_s19 = smov 0  }
   0x2   :  { %s1048_s20 = smov 0   ;;  %s1050_s21 = smov 0  }
   0x3 LB: > { %s1065_s22 = sadd.s32 4294967295, %s1008_s21   ;;  %s722_s23 = sadd.s32 4294967294, %s1008_s21   ;;  %s1008_s21 = sphi %s1050_s21, %s1245_s21   ;;  %s1004_s20 = sphi %s1048_s20, %s1244_s20   ;;  %s1000_s19 = sphi %s1046_s19, %s1243_s19   ;;  %s996_s18 = sphi %s1044_s18, %s1242_s18  }
   0x4   : > { %s1069_s24 = sadd.s32 1, %s1008_s21   ;;  %s140_s25 = sadd.s32 1, %s1004_s20 }
   0x5   : > { %s137_s26 = ssub.s32 %s1008_s21, %s1069_s24  ;;  %p150_p0 = scmp.ne.s32.totalorder %s1004_s20, %s1000_s19 }
   0x6   : > { %p138_p1 = scmp.eq.s32.totalorder %s137_s26, 0  ;;  %p151_p2 = scmp.eq.s32.totalorder %s1065_s22, 3 }
   0x7   : > { %p156_p3 = scmp.ne.s32.totalorder %s1000_s19, %s996_s18  ;;  %p157_p4 = scmp.eq.s32.totalorder %s722_s23, 3 }
   0x8   : > { %s1080_s27 = scalar_select %p138_p1, %s1004_s20, %s140_s25  }
   0x9   : > { %p1082_p5 = por %p151_p2, %p150_p0  ;;  %p1086_p6 = por %p157_p4, %p156_p3 }
   0xa   : > { %p725_p7 = scmp.ge.s32.totalorder %s1008_s21, 1  ;;  %p202_p8 = scmp.lt.s32.totalorder %s1008_s21, 5 }
   0xc   : > { %p203_p9 = pnand %p725_p7, %p202_p8 }
   0xd   : > { %s727_s30 = sshll.u32 (!%p203_p9), %s1065_s22, 1 }
   0xe   : > { %206 = sbr.rel (%p203_p9) target bundleno = 696 (0x2b8), region = 40  ;;  %p236_p10 = scmp.lt.s32.totalorder (!%p203_p9), %s727_s30, 7 }
  0x13   : > { %v1096_v0 = vld [vmem:[%s1235_s1] sm:$0xff]  ;;  %v1010_v2 = vmov 0   ;;  %v255_v3 = vld [vmem:[%s1238_s4 + $0x18] sm:$0xff]  ;;  %s1247_s30 = smov (!%p236_p10, %s727_s30), 7  ;;  %v251_v4 = vld [vmem:[%s1236_s2 + $0x8] sm:$0xff]  ;;  %vm366_vm0 = vcmask 261120  }
  0x14   : > { %v250_v1 = vld [vmem:[%s1236_s2] sm:$0xff]  ;;  %845 = vmatprep.mubr.f32.mxu0 %v1096_v0  ;;  %947 = vset.pattern.permute.xlu0 %v1010_v2  ;;  %s762_s14 = sshll.u32 %s1247_s30, 7  ;;  %v1135_v21 = vld [vmem:[%s1235_s1 + $0x8] sm:$0xff]  ;;  %v254_v22 = vld [vmem:[%s1238_s4 + $0x10] sm:$0xff]  ;;  %s1156_s13 = scalar_lea.vmem %s1237_s3, %s1247_s30 }
  0x15   : > { %274 = vperm.xlu0 %947, %v250_v1   ;;  %848 = vmatprep.subr.mxu1 %v255_v3  ;;  %s1114_s17 = scalar_lea.vmem %s1234_s0, %s762_s14  ;;  %v253_v23 = vld [vmem:[%s1238_s4 + $0x8] sm:$0xff]  ;;  %v252_v24 = vld [vmem:[%s1238_s4] sm:$0xff]  ;;  %s232_s30 = sand.u32 1, %s1000_s19  }
  0x16   : > { %849 = vmatpush3.msra.mxu1 %v255_v3  ;;  %v271_v5 = vld [vmem:[%s1114_s17 + $0x78] sm:$0xff]  ;;  %v270_v6 = vld [vmem:[%s1114_s17 + $0x70] sm:$0xff]  ;;  %v269_v7 = vld [vmem:[%s1114_s17 + $0x68] sm:$0xff]  ;;  %s726_s14 = sshll.u32 %s232_s30, 5  ;;  %s1194_s6 = scalar_lea.sflag [#allocation3], %s232_s30 }
  0x17   : > { %813 = vmatprep.subr.mxu0 %v271_v5  ;;  %v268_v8 = vld [vmem:[%s1114_s17 + $0x60] sm:$0xff]  ;;  %v267_v9 = vld [vmem:[%s1114_s17 + $0x58] sm:$0xff]  ;;  %v266_v10 = vld [vmem:[%s1114_s17 + $0x50] sm:$0xff]  ;;  %850 = vmatprep.subr.mxu1 %v254_v22  ;;  %s234_s15 = scalar_lea.vmem [#allocation2], %s726_s14 }
  0x18   : > { %814 = vmatpush3.msra.mxu0 %v271_v5  ;;  %v265_v11 = vld [vmem:[%s1114_s17 + $0x48] sm:$0xff]  ;;  %v264_v12 = vld [vmem:[%s1114_s17 + $0x40] sm:$0xff]  ;;  %v263_v13 = vld [vmem:[%s1114_s17 + $0x38] sm:$0xff]  ;;  %851 = vmatpush3.msra.mxu1 %v254_v22  ;;  %s651_s16 = sshll.u32 %s234_s15, 4  ;;  %s1187_s16 = int_to_ptr.vmem [resolvable:$true] %s651_s16 }
  0x19   : > { %279 = vperm.xlu0 %947, %v251_v4   ;;  %815 = vmatprep.subr.mxu0 %v270_v6  ;;  %v262_v14 = vld [vmem:[%s1114_s17 + $0x30] sm:$0xff]  ;;  %v261_v15 = vld [vmem:[%s1114_s17 + $0x28] sm:$0xff]  ;;  %v260_v16 = vld [vmem:[%s1114_s17 + $0x20] sm:$0xff]  ;;  %s948_s7 = scalar_lea.vmem %s1187_s16, 512 }
  0x1a   : > { %816 = vmatpush3.msra.mxu0 %v270_v6  ;;  %v259_v17 = vld [vmem:[%s1114_s17 + $0x18] sm:$0xff]  ;;  %v258_v18 = vld [vmem:[%s1114_s17 + $0x10] sm:$0xff]  ;;  %v257_v19 = vld [vmem:[%s1114_s17 + $0x8] sm:$0xff]  ;;  %852 = vmatprep.subr.mxu1 %v253_v23  ;;  %p949_p11 = scmp.ne.s32.totalorder %s1187_s16, %s948_s7 }
  0x1b   : > { %817 = vmatprep.subr.mxu0 %v269_v7  ;;  %v256_v20 = vld [vmem:[%s1114_s17] sm:$0xff]  ;;  %853 = vmatpush3.msra.mxu1 %v253_v23  ;;  %v749_v25 = vld [vmem:[%s1114_s17 + $0xf8] sm:$0xff]  ;;  %v748_v35 = vld [vmem:[%s1114_s17 + $0xf0] sm:$0xff] }
  0x1c   : > { %818 = vmatpush3.msra.mxu0 %v269_v7  ;;  %854 = vmatprep.subr.mxu1 %v252_v24  ;;  %v731_v31 = vld [vmem:[%s1156_s13] ss:$0 sm:$0xff]  ;;  %v747_v36 = vld [vmem:[%s1114_s17 + $0xe8] sm:$0xff]  ;;  %v745_v38 = vld [vmem:[%s1114_s17 + $0xd8] sm:$0xff]  ;;  %p950_p12 = pnand %p949_p11, %p1082_p5 }
  0x1d   : > { %819 = vmatprep.subr.mxu0 %v268_v8  ;;  %855 = vmatpush3.msra.mxu1 %v252_v24  ;;  %v746_v37 = vld [vmem:[%s1114_s17 + $0xe0] sm:$0xff]  ;;  %v744_v39 = vld [vmem:[%s1114_s17 + $0xd0] sm:$0xff]  ;;  %v743_v40 = vld [vmem:[%s1114_s17 + $0xc8] sm:$0xff] }
  0x1e   : > { %820 = vmatpush3.msra.mxu0 %v268_v8  ;;  %859 = vmatprep.subr.mxu1 %v749_v25  ;;  %v742_v41 = vld [vmem:[%s1114_s17 + $0xc0] sm:$0xff]  ;;  %v741_v42 = vld [vmem:[%s1114_s17 + $0xb8] sm:$0xff]  ;;  %v740_v43 = vld [vmem:[%s1114_s17 + $0xb0] sm:$0xff]  ;;  %p951_p13 = pneg %p950_p12 }
  0x1f   : > { %821 = vmatprep.subr.mxu0 %v267_v9  ;;  %v739_v44 = vld [vmem:[%s1114_s17 + $0xa8] sm:$0xff]  ;;  %v738_v45 = vld [vmem:[%s1114_s17 + $0xa0] sm:$0xff]  ;;  %v737_v46 = vld [vmem:[%s1114_s17 + $0x98] sm:$0xff] }
  0x20   : > { %822 = vmatpush3.msra.mxu0 %v267_v9  ;;  %v736_v47 = vld [vmem:[%s1114_s17 + $0x90] sm:$0xff]  ;;  %v735_v48 = vld [vmem:[%s1114_s17 + $0x88] sm:$0xff]  ;;  %v734_v49 = vld [vmem:[%s1114_s17 + $0x80] sm:$0xff]  ;;  %s764_s17 = sshll.u32 %s1065_s22, 9  ;;  %s1011_s22 = smov [#allocation2]  }
  0x21   : > { %823 = vmatprep.subr.mxu0 %v266_v10  ;;  %v751_v55 = vld [vmem:[%s1156_s13 + $0x1] ss:$0 sm:$0xff]  ;;  %s1192_s26 = scalar_lea.hbm %s1239_s5, %s764_s17  ;;  %s952_s8 = sshll.u32 %s1011_s22, 4  ;;  %s953_s8 = int_to_ptr.vmem [resolvable:$false] %s952_s8 }
  0x22   : > { %824 = vmatpush3.msra.mxu0 %v266_v10  ;;  %s954_s9 = scalar_lea.vmem %s953_s8, 1024  ;;  %p955_p0 = scmp.lt.s32.totalorder %s1187_s16, %s953_s8 }
  0x23   : > { %825 = vmatprep.subr.mxu0 %v265_v11  ;;  %p956_p1 = scmp.lt.s32.totalorder %s954_s9, %s948_s7 }
  0x24   : > { %826 = vmatpush3.msra.mxu0 %v265_v11 }
  0x25   : > { %827 = vmatprep.subr.mxu0 %v264_v12  ;;  %p957_p2 = por %p956_p1, %p955_p0 }
  0x26   : > { %828 = vmatpush3.msra.mxu0 %v264_v12 }
  0x27   : > { %829 = vmatprep.subr.mxu0 %v263_v13  ;;  %p958_p3 = pnand %p957_p2, %p951_p13 }
  0x28   : > { %830 = vmatpush3.msra.mxu0 %v263_v13 }
  0x29   : > { %831 = vmatprep.subr.mxu0 %v262_v14 }
  0x2a   : > { %832 = vmatpush3.msra.mxu0 %v262_v14 }
  0x2b   : > { %833 = vmatprep.subr.mxu0 %v261_v15 }
  0x2c   : > { %834 = vmatpush3.msra.mxu0 %v261_v15 }
  0x2d   : > { %835 = vmatprep.subr.mxu0 %v260_v16 }
  0x2e   : > { %836 = vmatpush3.msra.mxu0 %v260_v16 }
  0x2f   : > { %837 = vmatprep.subr.mxu0 %v259_v17 }
  0x30   : > { %838 = vmatpush3.msra.mxu0 %v259_v17 }
  0x31   : > { %839 = vmatprep.subr.mxu0 %v258_v18 }
  0x32   : > { %840 = vmatpush3.msra.mxu0 %v258_v18 }
  0x33   : > { %841 = vmatprep.subr.mxu0 %v257_v19 }
  0x34   : > { %842 = vmatpush3.msra.mxu0 %v257_v19 }
  0x35   : > { %843 = vmatprep.subr.mxu0 %v256_v20 }
  0x36   : > { %844 = vmatpush3.msra.mxu0 %v256_v20 }
  0x37   : > { %846 = vmatmul.mubr.f32.vlgmr.msra.gmra.mxu0 %v1135_v21  ;;  %894 = vmatprep.subr.mxu0 %v255_v3 }
  0x38   : > { %895 = vmatpush3.msra.mxu0 %v255_v3 }
  0x39   : > { %896 = vmatprep.subr.mxu0 %v254_v22 }
  0x3a   : > { %897 = vmatpush3.msra.mxu0 %v254_v22 }
  0x3b   : > { %898 = vmatprep.subr.mxu0 %v253_v23 }
  0x3c   : > { %899 = vmatpush3.msra.mxu0 %v253_v23 }
  0x3d   : > { %900 = vmatprep.subr.mxu0 %v252_v24 }
  0x3e   : > { %901 = vmatpush3.msra.mxu0 %v252_v24 }
  0x90   : > { %v1148_v26 = vpop.permute.xlu0 %274 }
  0x94   : > { %v1150_v27 = vpop.permute.xlu0 %279 }
  0xf7   : > { %v847_v28 = vpop.f32.mrf.mxu0 }
  0xf8   : > { %v354_v29 = vadd.f32 %v847_v28, %v1150_v27 }
  0xf9   : > { %v348_v30 = vpop.f32.mrf.mxu0 }
  0xfa   : > { %v349_v32 = vadd.f32 %v348_v30, %v1148_v26  ;;  %v365_v34 = vmul.f32 %v731_v31, %v354_v29 }
  0xfc   : > { %v364_v33 = vmul.f32 %v731_v31, %v349_v32 }
  0xfe   : > { %856 = vmatprep.mubr.msk.f32.mxu1 %vm366_vm0, %v364_v33 }
  0xff   : > { %857 = vmatmul.mubr.msk.f32.vlgmr.msra.gmra.mxu1 %vm366_vm0, %v365_v34 }
 0x100   : > { %860 = vmatpush3.msra.mxu1 %v749_v25  ;;  %891 = vmatprep.mubr.f32.mxu1 %v1096_v0 }
 0x101   : > { %861 = vmatprep.subr.mxu1 %v748_v35 }
 0x102   : > { %862 = vmatpush3.msra.mxu1 %v748_v35 }
 0x103   : > { %863 = vmatprep.subr.mxu1 %v747_v36 }
 0x104   : > { %864 = vmatpush3.msra.mxu1 %v747_v36 }
 0x105   : > { %865 = vmatprep.subr.mxu1 %v746_v37 }
 0x106   : > { %866 = vmatpush3.msra.mxu1 %v746_v37 }
 0x107   : > { %867 = vmatprep.subr.mxu1 %v745_v38 }
 0x108   : > { %868 = vmatpush3.msra.mxu1 %v745_v38 }
 0x109   : > { %869 = vmatprep.subr.mxu1 %v744_v39 }
 0x10a   : > { %870 = vmatpush3.msra.mxu1 %v744_v39 }
 0x10b   : > { %871 = vmatprep.subr.mxu1 %v743_v40 }
 0x10c   : > { %872 = vmatpush3.msra.mxu1 %v743_v40 }
 0x10d   : > { %873 = vmatprep.subr.mxu1 %v742_v41 }
 0x10e   : > { %874 = vmatpush3.msra.mxu1 %v742_v41 }
 0x10f   : > { %875 = vmatprep.subr.mxu1 %v741_v42 }
 0x110   : > { %876 = vmatpush3.msra.mxu1 %v741_v42 }
 0x111   : > { %877 = vmatprep.subr.mxu1 %v740_v43 }
 0x112   : > { %878 = vmatpush3.msra.mxu1 %v740_v43 }
 0x113   : > { %879 = vmatprep.subr.mxu1 %v739_v44 }
 0x114   : > { %880 = vmatpush3.msra.mxu1 %v739_v44 }
 0x115   : > { %881 = vmatprep.subr.mxu1 %v738_v45 }
 0x116   : > { %882 = vmatpush3.msra.mxu1 %v738_v45 }
 0x117   : > { %883 = vmatprep.subr.mxu1 %v737_v46 }
 0x118   : > { %884 = vmatpush3.msra.mxu1 %v737_v46 }
 0x119   : > { %885 = vmatprep.subr.mxu1 %v736_v47 }
 0x11a   : > { %886 = vmatpush3.msra.mxu1 %v736_v47 }
 0x11b   : > { %887 = vmatprep.subr.mxu1 %v735_v48 }
 0x11c   : > { %888 = vmatpush3.msra.mxu1 %v735_v48 }
 0x11d   : > { %889 = vmatprep.subr.mxu1 %v734_v49 }
 0x11e   : > { %890 = vmatpush3.msra.mxu1 %v734_v49 }
 0x11f   : > { %892 = vmatmul.mubr.f32.vlgmr.msra.gmra.mxu1 %v1135_v21 }
 0x1bf   : > { %v858_v50 = vpop.f32.mrf.mxu1 }
 0x1c0   : > { %449 = vst [vmem:[%s234_s15 + $0x8] sm:$0xff] %v858_v50 }
 0x1c1   : > { %v439_v51 = vpop.f32.mrf.mxu1 }
 0x1c2   : > { %448 = vst [vmem:[%s234_s15] sm:$0xff] %v439_v51 }
 0x1df   : > { %v893_v52 = vpop.f32.mrf.mxu1 }
 0x1e0   : > { %v539_v53 = vadd.f32 %v893_v52, %v1150_v27 }
 0x1e1   : > { %v533_v54 = vpop.f32.mrf.mxu1 }
 0x1e2   : > { %v534_v56 = vadd.f32 %v533_v54, %v1148_v26  ;;  %v551_v58 = vmul.f32 %v751_v55, %v539_v53 }
 0x1e4   : > { %v550_v57 = vmul.f32 %v751_v55, %v534_v56 }
 0x1e6   : > { %902 = vmatprep.mubr.msk.f32.mxu0 %vm366_vm0, %v550_v57 }
 0x1e7   : > { %903 = vmatmul.mubr.msk.f32.vlgmr.msra.gmra.mxu0 %vm366_vm0, %v551_v58 }
 0x2a7   : > { %v904_v59 = vpop.f32.mrf.mxu0 }
 0x2a8   : > { %755 = vst [vmem:[%s234_s15 + $0x18] sm:$0xff] %v904_v59 }
 0x2a9   : > { %v624_v60 = vpop.f32.mrf.mxu0 }
 0x2aa   : > { %754 = vst [vmem:[%s234_s15 + $0x10] sm:$0xff] %v624_v60 }
 0x2ab   : > { %961 = shalt.err (!%p958_p3)
}
 0x2ac   : > { %s962_s10 = scalar_lea.hbm %s1192_s26, 512  ;;  %s966_s13 = scalar_lea.hbm %s1239_s5, 2048 }
 0x2ad   : > { %p963_p4 = scmp.ne.s32.totalorder %s1192_s26, %s962_s10  ;;  %p967_p9 = scmp.lt.s32.totalorder %s1192_s26, %s1239_s5 }
 0x2ae   : > { %p968_p10 = scmp.lt.s32.totalorder %s966_s13, %s962_s10 }
 0x2af   : > { %p964_p7 = pnand %p963_p4, %p1082_p5 }
 0x2b0   : > { %p969_p11 = por %p968_p10, %p967_p9 }
 0x2b1   : > { %p965_p8 = pneg %p964_p7 }
 0x2b3   : > { %p970_p12 = pnand %p969_p11, %p965_p8 }
 0x2b5   : > { %973 = shalt.err (!%p970_p12)
}
 0x2b6   : > { %s1012_s15 = smov 128   ;;  %s1013_s17 = smov 8  }
 0x2b7   : > { %905 = dma.vmem_to_hbm [thread:$0]  (%p1082_p5), %s1187_s16, 512, %s1192_s26, %s1194_s6, %s1012_s15, %s1012_s15, %s1013_s17  }
 0x2b8 PF: > { %p911_p13 = scmp.ge.s32.totalorder %s1008_s21, 2  ;;  %s666_s23 = sand.u32 1, %s996_s18  }
 0x2b9   : > { %s667_s25 = scalar_lea.sflag [#allocation3], %s666_s23 }
 0x2ba   : > { %p908_p0 = pnand %p911_p13, %p1086_p6 }
 0x2bc   : > { %p909_p1 = pneg %p908_p0 }
 0x2be   : > { %991 = dma.done.wait (%p909_p1), %s667_s25, 512  }
 0x2bf   : > { %993 = vsyncadd (%p909_p1), %s667_s25, 4294966784  ;;  %p15_p2 = scmp.ge.s32.totalorder %s1069_s24, 6   ;;  %s1242_s18 = smov %s1000_s19 }
 0x2c0   : > { %s1243_s19 = smov %s1004_s20  ;;  %s1244_s20 = smov %s1080_s27 }
 0x2c1   : > { %s1245_s21 = smov %s1069_s24  ;;  %17 = sbr.rel (!%p15_p2) target bundleno = 3 (0x3), region = 81 }
 0x2c6   :  { %672 = vsyncpa [#allocation3], 1 }
 0x2c7   :  { %674 = vsyncpa [#allocation3 + $0x1], 1 }

</bundles_post_ra>
